<compile_context>
chip_gen: v7x
topology: tpu7x:2x2x1
jax: 0.10.0
libtpu: 0.0.40
codegen_flags: <defaults>
</compile_context>

<pallas_src>
import functools

import jax
import jax.numpy as jnp
from jax import lax
from jax.experimental import pallas as pl
from jax.experimental.pallas import tpu as pltpu


def _cosine_margin_kernel(x_ref, wt_ref, inv_xn_ref, inv_wn_s_ref, label_ref,
                          o_ref, *, sm):
    j = pl.program_id(0)                       # class-tile index (outer grid axis)
    tb, tc = o_ref.shape

    # Raw inner products on the MXU: bf16 operands, f32 accumulate. W is already
    # (D, C) so this is the natural (m,k)x(k,n) contraction - no tile transpose.
    raw = lax.dot_general(
        x_ref[...], wt_ref[...],
        dimension_numbers=(((1,), (0,)), ((), ())),
        preferred_element_type=jnp.float32)                 # (tb, tc) f32

    # s * cos = raw * (1/||x||) * (s/||w||); both scales precomputed in wrapper.
    scaled = raw * inv_xn_ref[...] * inv_wn_s_ref[...]

    # CosFace margin via predicated select against globally-offset class ids.
    # NOTE: out-of-range labels (e.g. -1 sentinel) simply get no margin here,
    # whereas torch scatter_ would raise.
    class_ids = j * tc + lax.broadcasted_iota(jnp.int32, (tb, tc), 1)
    o_ref[...] = jnp.where(class_ids == label_ref[...], scaled - sm, scaled)


def _round_up(n, a):
    return ((n + a - 1) // a) * a


def _pick_tile(n, max_tile, align):
    """Tile (multiple of `align`, <= max_tile) plus the padded dim it divides."""
    t = min(_round_up(n, align), _round_up(max_tile, align))
    return t, _round_up(n, t)


def cosine_margin_product(x, weight, label, *, s=30.0, m=0.35,
                          tb_max=256, tc_max=2048):
    """x: (B, D), weight: (C, D), label: (B,) or (B,1) int -> (B, C) float32."""
    B, D = x.shape
    C, D2 = weight.shape
    assert D == D2, "feature dims of x and weight must match"

    x_f32 = x.astype(jnp.float32)
    w_f32 = weight.astype(jnp.float32)

    # Hoisted normalization scales, computed once in f32 and reused by all tiles.
    # F.normalize semantics: v / max(||v||, 1e-12) == v * rsqrt(max(||v||^2, 1e-24)).
    inv_xn = lax.rsqrt(
        jnp.maximum(jnp.sum(x_f32 * x_f32, axis=-1, keepdims=True), 1e-24))      # (B, 1)
    inv_wn_s = (float(s) * lax.rsqrt(
        jnp.maximum(jnp.sum(w_f32 * w_f32, axis=-1), 1e-24))).reshape(1, C)      # (1, C)

    # Tile sizes: bf16 sublane packing wants tb % 16 == 0; lane-dense tc % 128 == 0.
    tb, B_pad = _pick_tile(B, tb_max, 16)
    tc, C_pad = _pick_tile(C, tc_max, 128)

    # Keep the double-buffered working set within a conservative VMEM budget
    # (v7x: 64 MiB physical / 32 MiB default scoped).
    def vmem_est(tb_, tc_):
        return 2 * (tb_ * D * 2 + D * tc_ * 2 + tb_ * tc_ * 4 + tc_ * 4 + 2 * tb_ * 4)

    while vmem_est(tb, tc) > (48 << 20) and tc > 128:
        tc //= 2
        C_pad = _round_up(C, tc)

    # bf16 matmul operands streamed straight from HBM; W pre-transposed to (D, C).
    x_bf = jnp.pad(x.astype(jnp.bfloat16), ((0, B_pad - B), (0, 0)))
    wt_bf = jnp.pad(weight.astype(jnp.bfloat16).T, ((0, 0), (0, C_pad - C)))
    inv_xn_p = jnp.pad(inv_xn, ((0, B_pad - B), (0, 0)))
    inv_wn_p = jnp.pad(inv_wn_s, ((0, 0), (0, C_pad - C)))
    label2d = jnp.pad(label.reshape(-1, 1).astype(jnp.int32),
                      ((0, B_pad - B), (0, 0)), constant_values=-1)

    kernel = functools.partial(_cosine_margin_kernel, sm=float(s) * float(m))
    vmem_limit = int(min(max(vmem_est(tb, tc) + (4 << 20), 16 << 20), 60 << 20))

    out = pl.pallas_call(
        kernel,
        out_shape=jax.ShapeDtypeStruct((B_pad, C_pad), jnp.float32),
        grid_spec=pltpu.PrefetchScalarGridSpec(
            num_scalar_prefetch=0,
            # Class axis outer, batch axis inner -> each W tile is read once.
            grid=(C_pad // tc, B_pad // tb),
            in_specs=[
                pl.BlockSpec((tb, D), lambda j, i: (i, 0)),   # x tile (bf16)
                pl.BlockSpec((D, tc), lambda j, i: (0, j)),   # W^T tile (bf16)
                pl.BlockSpec((tb, 1), lambda j, i: (i, 0)),   # 1/||x||
                pl.BlockSpec((1, tc), lambda j, i: (0, j)),   # s/||w||
                pl.BlockSpec((tb, 1), lambda j, i: (i, 0)),   # label
            ],
            out_specs=pl.BlockSpec((tb, tc), lambda j, i: (i, j)),
        ),
        compiler_params=pltpu.CompilerParams(
            dimension_semantics=("parallel", "parallel"),
            vmem_limit_bytes=vmem_limit),
    )(x_bf, wt_bf, inv_xn_p, inv_wn_p, label2d)

    return out[:B, :C]


if __name__ == "__main__":
    # Small shapes consistent with the module defaults (in_feature=512, out_feature=10).
    B, D, C = 16, 512, 10
    s, m = 30.0, 0.35

    key = jax.random.PRNGKey(0)
    kx, kw, kl = jax.random.split(key, 3)

    x = jax.random.normal(kx, (B, D), dtype=jnp.float32)

    # Deterministic xavier_uniform_-style init for weight (out_feature, in_feature):
    bound = (6.0 / (D + C)) ** 0.5
    weight = jax.random.uniform(kw, (C, D), dtype=jnp.float32,
                                minval=-bound, maxval=bound)

    label = jax.random.randint(kl, (B,), 0, C, dtype=jnp.int32)

    out = cosine_margin_product(x, weight, label, s=s, m=m)
    out = jax.block_until_ready(out)

    # Pure-JAX f32 reference. Kernel streams x/W in bf16 (f32 accumulate), so
    # |cos err| <~ 2^-8; scaled by s=30 -> a few tenths absolute worst case.
    x_n = x / jnp.maximum(jnp.linalg.norm(x, axis=-1, keepdims=True), 1e-12)
    w_n = weight / jnp.maximum(jnp.linalg.norm(weight, axis=-1, keepdims=True), 1e-12)
    cos_ref = x_n @ w_n.T
    one_hot = jax.nn.one_hot(label, C, dtype=jnp.float32)
    ref = s * (cos_ref - one_hot * m)

    assert out.shape == (B, C)
    assert bool(jnp.allclose(out, ref, atol=0.25, rtol=0.02)), "mismatch vs reference"

    print("KERNEL_OK")
</pallas_src>

<mosaic_0001>
module attributes {stable_mosaic.version = 11 : i64} {
  func.func @_cosine_margin_kernel(%arg0: i32, %arg1: i32, %arg2: memref<16x512xbf16, #tpu.memory_space<vmem>>, %arg3: memref<512x128xbf16, #tpu.memory_space<vmem>>, %arg4: memref<16x1xf32, #tpu.memory_space<vmem>>, %arg5: memref<1x128xf32, #tpu.memory_space<vmem>>, %arg6: memref<16x1xi32, #tpu.memory_space<vmem>>, %arg7: memref<16x128xf32, #tpu.memory_space<vmem>>) attributes {dimension_semantics = [#tpu.dimension_semantics<parallel>, #tpu.dimension_semantics<parallel>], iteration_bounds = array<i64: 1, 1>, scalar_prefetch = 0 : i64, scratch_operands = 0 : i64, tpu.core_type = #tpu.core_type<tc>, window_params = [{transform_indices = @transform_0, window_bounds = array<i64: 16, 512>}, {transform_indices = @transform_1, window_bounds = array<i64: 512, 128>}, {transform_indices = @transform_2, window_bounds = array<i64: 16, 1>}, {transform_indices = @transform_3, window_bounds = array<i64: 1, 128>}, {transform_indices = @transform_4, window_bounds = array<i64: 16, 1>}, {transform_indices = @transform_5, window_bounds = array<i64: 16, 128>}]} {
    %c0 = arith.constant 0 : index
    %c0_0 = arith.constant 0 : index
    %0 = vector.load %arg2[%c0, %c0_0] : memref<16x512xbf16, #tpu.memory_space<vmem>>, vector<16x512xbf16>
    %c0_1 = arith.constant 0 : index
    %c0_2 = arith.constant 0 : index
    %1 = vector.load %arg3[%c0_1, %c0_2] : memref<512x128xbf16, #tpu.memory_space<vmem>>, vector<512x128xbf16>
    %cst = arith.constant dense<0.000000e+00> : vector<16x128xf32>
    %2 = tpu.matmul %0, %1, %cst {dimension_numbers = #tpu.dot_dimension_numbers<[1], [0], [0], [1], [0, 0, 1, 1], [], []>} : vector<16x512xbf16>, vector<512x128xbf16>, vector<16x128xf32> -> vector<16x128xf32>
    %c0_3 = arith.constant 0 : index
    %c0_4 = arith.constant 0 : index
    %3 = vector.load %arg4[%c0_3, %c0_4] : memref<16x1xf32, #tpu.memory_space<vmem>>, vector<16x1xf32>
    %4 = vector.broadcast %3 : vector<16x1xf32> to vector<16x128xf32>
    %5 = arith.mulf %2, %4 : vector<16x128xf32>
    %c0_5 = arith.constant 0 : index
    %c0_6 = arith.constant 0 : index
    %6 = vector.load %arg5[%c0_5, %c0_6] : memref<1x128xf32, #tpu.memory_space<vmem>>, vector<1x128xf32>
    %7 = vector.broadcast %6 : vector<1x128xf32> to vector<16x128xf32>
    %8 = arith.mulf %5, %7 : vector<16x128xf32>
    %c128_i32 = arith.constant 128 : i32
    %9 = arith.muli %arg0, %c128_i32 : i32
    %10 = tpu.iota {dimensions = array<i32: 1>} : vector<16x128xi32>
    %11 = vector.broadcast %9 : i32 to vector<16x128xi32>
    %12 = arith.addi %11, %10 : vector<16x128xi32>
    %c0_7 = arith.constant 0 : index
    %c0_8 = arith.constant 0 : index
    %13 = vector.load %arg6[%c0_7, %c0_8] : memref<16x1xi32, #tpu.memory_space<vmem>>, vector<16x1xi32>
    %14 = vector.broadcast %13 : vector<16x1xi32> to vector<16x128xi32>
    %15 = arith.cmpi eq, %12, %14 : vector<16x128xi32>
    %cst_9 = arith.constant 1.050000e+01 : f32
    %16 = vector.broadcast %cst_9 : f32 to vector<16x128xf32>
    %17 = arith.subf %8, %16 : vector<16x128xf32>
    %18 = arith.select %15, %17, %8 : vector<16x128xi1>, vector<16x128xf32>
    %c0_10 = arith.constant 0 : index
    %c0_11 = arith.constant 0 : index
    %19 = vector.load %arg7[%c0_10, %c0_11] : memref<16x128xf32, #tpu.memory_space<vmem>>, vector<16x128xf32>
    tpu.vector_store %arg7[%c0_10, %c0_11], %18 {strides = array<i32>} : memref<16x128xf32, #tpu.memory_space<vmem>>, vector<16x128xf32>,
    return
  }
  func.func @transform_0(%arg0: i32, %arg1: i32) -> (i32, i32) {
    %c0_i32 = arith.constant 0 : i32
    %c0_i32_0 = arith.constant 0 : i32
    return %arg1, %c0_i32 : i32, i32
  }
  func.func @transform_1(%arg0: i32, %arg1: i32) -> (i32, i32) {
    %c0_i32 = arith.constant 0 : i32
    %c0_i32_0 = arith.constant 0 : i32
    return %c0_i32, %arg0 : i32, i32
  }
  func.func @transform_2(%arg0: i32, %arg1: i32) -> (i32, i32) {
    %c0_i32 = arith.constant 0 : i32
    %c0_i32_0 = arith.constant 0 : i32
    return %arg1, %c0_i32 : i32, i32
  }
  func.func @transform_3(%arg0: i32, %arg1: i32) -> (i32, i32) {
    %c0_i32 = arith.constant 0 : i32
    %c0_i32_0 = arith.constant 0 : i32
    return %c0_i32, %arg0 : i32, i32
  }
  func.func @transform_4(%arg0: i32, %arg1: i32) -> (i32, i32) {
    %c0_i32 = arith.constant 0 : i32
    %c0_i32_0 = arith.constant 0 : i32
    return %arg1, %c0_i32 : i32, i32
  }
  func.func @transform_5(%arg0: i32, %arg1: i32) -> (i32, i32) {
    %c0_i32 = arith.constant 0 : i32
    return %arg1, %arg0 : i32, i32
  }
}

</mosaic_0001>

<bundles_post_ra>
// kernel: tpu_custom_call.1
= control target key start
LH: loop header
LB: loop body
LE: loop exit
PB: predicated region body
PF: predicated region fallthrough
CT: control target
= control target key end

     0   :  { %10 = vsyncpa [#allocation3], 0  ;;  %s725_s0 = inlined_call_operand.vmem [shape: bf16[16,512], index: 0, kind: input, shape index: {}]   ;;  %s726_s1 = inlined_call_operand.hbm [shape: bf16[512,128], index: 1, kind: input, shape index: {}]   ;;  %s727_s2 = inlined_call_operand.vmem [shape: f32[16,1], index: 2, kind: input, shape index: {}]   ;;  %s728_s3 = inlined_call_operand.vmem [shape: f32[1,128], index: 3, kind: input, shape index: {}]   ;;  %s729_s4 = inlined_call_operand.vmem [shape: s32[16,1], index: 4, kind: input, shape index: {}]   ;;  %s730_s5 = inlined_call_operand.hbm [shape: f32[16,128], index: 5, kind: output, shape index: {}]  }
   0x1   :  { %11 = vsyncpa [#allocation4], 0  ;;  %s637_s18 = smov [#allocation2]   ;;  %s589_s22 = scalar_lea.hbm %s726_s1, 4096 }
   0x2   :  { %s19_s19 = sshll.u32 %s637_s18, 4  ;;  %p590_p0 = scmp.ne.s32.totalorder %s726_s1, %s589_s22  ;;  %s20_s19 = int_to_ptr.vmem [resolvable:$true] %s19_s19 }
   0x3   :  { %p593_p1 = scmp.lt.u32.totalorder %s589_s22, %s726_s1 }
   0x5   :  { %p595_p2 = pnand %p593_p1, %p590_p0 }
   0x7   :  { %598 = shalt.err (!%p595_p2)
}
   0x8   :  { %s599_s27 = scalar_lea.vmem %s20_s19, 4096  ;;  %p604_p4 = scmp.lt.s32.totalorder %s20_s19, %s20_s19 }
   0x9   :  { %p600_p3 = scmp.ne.s32.totalorder %s20_s19, %s599_s27  ;;  %p605_p5 = scmp.lt.s32.totalorder %s599_s27, %s599_s27 }
   0xb   :  { %p606_p6 = por %p605_p5, %p604_p4 }
   0xd   :  { %p607_p7 = pnand %p606_p6, %p600_p3 }
   0xf   :  { %610 = shalt.err (!%p607_p7)
}
  0x10   :  { %s638_s28 = smov 64   ;;  %s639_s29 = smov 4  }
  0x11   :  { %25 = dma.hbm_to_vmem [thread:$0]  %s726_s1, 4096, %s20_s19, [#allocation3], %s638_s28, %s638_s28, %s639_s29  }
  0x12   :  { %633 = dma.done.wait [#allocation3], 4096  }
  0x13   :  { %634 = vsyncadd [#allocation3], 4294963200  ;;  %v640_v0 = vmov 0   ;;  %v551_v1 = vld [vmem:[#allocation2 + $0x40] sm:$0xff]   ;;  %v555_v5 = vld [vmem:[#allocation2 + $0x48] sm:$0xff]   ;;  %v422_v53 = vlaneseq  ;;  %s641_s21 = smov [#allocation5]  }
  0x14   :  { %549 = vset.pattern.permute.xlu0 %v640_v0  ;;  %550 = vset.pattern.permute.xlu1 %v640_v0  ;;  %v552_v2 = vld [vmem:[#allocation2 + $0xc0] sm:$0xff]   ;;  %v556_v6 = vld [vmem:[#allocation2 + $0xc8] sm:$0xff]   ;;  %v559_v9 = vld [vmem:[#allocation2 + $0x50] sm:$0xff]   ;;  %s447_s22 = sshll.u32 %s641_s21, 4  ;;  %s448_s22 = int_to_ptr.vmem [resolvable:$true] %s447_s22 }
  0x15   :  { %498 = vmatprep.subr.bf16.mxu0 %v551_v1  ;;  %v553_v3 = vld [vmem:[#allocation2] sm:$0xff]   ;;  %520 = vmatprep.subr.bf16.mxu1 %v552_v2  ;;  %v557_v7 = vld [vmem:[#allocation2 + $0x8] sm:$0xff]   ;;  %v560_v10 = vld [vmem:[#allocation2 + $0xd0] sm:$0xff]   ;;  %v423_v61 = vand.u32 127, %v422_v53  ;;  %p616_p9 = scmp.lt.s32.totalorder %s448_s22, %s448_s22 }
  0x16   :  { %v554_v4 = vld [vmem:[#allocation2 + $0x80] sm:$0xff]   ;;  %499 = vmatpush3.bf16.msra.mxu0 %v553_v3  ;;  %v558_v8 = vld [vmem:[#allocation2 + $0x88] sm:$0xff]   ;;  %v561_v11 = vld [vmem:[#allocation2 + $0x10] sm:$0xff]  }
  0x17   :  { %521 = vmatpush3.bf16.msra.mxu1 %v554_v4  ;;  %500 = vmatprep.subr.bf16.mxu0 %v555_v5  ;;  %v562_v12 = vld [vmem:[#allocation2 + $0x90] sm:$0xff]   ;;  %v563_v13 = vld [vmem:[#allocation2 + $0x58] sm:$0xff]   ;;  %v567_v17 = vld [vmem:[#allocation2 + $0x60] sm:$0xff]  }
  0x18   :  { %522 = vmatprep.subr.bf16.mxu1 %v556_v6  ;;  %v564_v14 = vld [vmem:[#allocation2 + $0xd8] sm:$0xff]   ;;  %v568_v18 = vld [vmem:[#allocation2 + $0xe0] sm:$0xff]   ;;  %v571_v21 = vld [vmem:[#allocation2 + $0x68] sm:$0xff]  }
  0x19   :  { %v565_v15 = vld [vmem:[#allocation2 + $0x18] sm:$0xff]   ;;  %v569_v19 = vld [vmem:[#allocation2 + $0x20] sm:$0xff]   ;;  %v572_v22 = vld [vmem:[#allocation2 + $0xe8] sm:$0xff]  }
  0x1a   :  { %501 = vmatpush3.bf16.msra.mxu0 %v557_v7  ;;  %v566_v16 = vld [vmem:[#allocation2 + $0x98] sm:$0xff]   ;;  %v570_v20 = vld [vmem:[#allocation2 + $0xa0] sm:$0xff]   ;;  %v573_v23 = vld [vmem:[#allocation2 + $0x28] sm:$0xff]  }
  0x1b   :  { %523 = vmatpush3.bf16.msra.mxu1 %v558_v8  ;;  %502 = vmatprep.subr.bf16.mxu0 %v559_v9  ;;  %v574_v24 = vld [vmem:[#allocation2 + $0xa8] sm:$0xff]   ;;  %v575_v25 = vld [vmem:[#allocation2 + $0x70] sm:$0xff]   ;;  %v579_v29 = vld [vmem:[#allocation2 + $0x78] sm:$0xff]  }
  0x1c   :  { %524 = vmatprep.subr.bf16.mxu1 %v560_v10  ;;  %v576_v26 = vld [vmem:[#allocation2 + $0xf0] sm:$0xff]   ;;  %v580_v30 = vld [vmem:[#allocation2 + $0xf8] sm:$0xff]   ;;  %v398_v37 = vld [vmem:[%s727_s2] sm:$0xff] }
  0x1d   :  { %v577_v27 = vld [vmem:[#allocation2 + $0x30] sm:$0xff]   ;;  %v581_v31 = vld [vmem:[#allocation2 + $0x38] sm:$0xff]   ;;  %402 = vperm.xlu0 %549, %v398_v37   ;;  %v426_v38 = vld [vmem:[%s729_s4] sm:$0xff] }
  0x1e   :  { %503 = vmatpush3.bf16.msra.mxu0 %v561_v11  ;;  %v578_v28 = vld [vmem:[#allocation2 + $0xb0] sm:$0xff]   ;;  %v582_v32 = vld [vmem:[#allocation2 + $0xb8] sm:$0xff]   ;;  %v399_v39 = vld [vmem:[%s727_s2 + $0x8] sm:$0xff]  ;;  %429 = vperm.xlu1 %550, %v426_v38  }
  0x1f   :  { %525 = vmatpush3.bf16.msra.mxu1 %v562_v12  ;;  %504 = vmatprep.subr.bf16.mxu0 %v563_v13  ;;  %v583_v33 = vld [vmem:[%s725_s0] ss:$16 sps:$4 sm:$0xff]   ;;  %v585_v34 = vld [vmem:[%s725_s0 + $0x4] ss:$16 sps:$4 sm:$0xff]   ;;  %v586_v35 = vld [vmem:[%s725_s0 + $0x8] ss:$16 sps:$4 sm:$0xff]  }
  0x20   :  { %526 = vmatprep.subr.bf16.mxu1 %v564_v14  ;;  %v588_v36 = vld [vmem:[%s725_s0 + $0xc] ss:$16 sps:$4 sm:$0xff]   ;;  %348 = vmatprep.mubr.bf16.mxu0 %v585_v34  ;;  %v495_v57 = vld [vmem:[%s728_s3] ss:$0 sm:$0xff]  ;;  %s611_s3 = scalar_lea.vmem %s448_s22, 256 }
  0x21   :  { %389 = vmatprep.mubr.bf16.mxu1 %v588_v36  ;;  %v427_v40 = vld [vmem:[%s729_s4 + $0x8] sm:$0xff]  ;;  %407 = vperm.xlu0 %549, %v399_v39   ;;  %p612_p8 = scmp.ne.s32.totalorder %s448_s22, %s611_s3  ;;  %p617_p10 = scmp.lt.s32.totalorder %s611_s3, %s611_s3 }
  0x22   :  { %505 = vmatpush3.bf16.msra.mxu0 %v565_v15  ;;  %432 = vperm.xlu1 %550, %v427_v40  }
  0x23   :  { %527 = vmatpush3.bf16.msra.mxu1 %v566_v16  ;;  %506 = vmatprep.subr.bf16.mxu0 %v567_v17  ;;  %p618_p11 = por %p617_p10, %p616_p9 }
  0x24   :  { %528 = vmatprep.subr.bf16.mxu1 %v568_v18 }
  0x25   :  { %p619_p12 = pnand %p618_p11, %p612_p8 }
  0x26   :  { %507 = vmatpush3.bf16.msra.mxu0 %v569_v19 }
  0x27   :  { %529 = vmatpush3.bf16.msra.mxu1 %v570_v20  ;;  %508 = vmatprep.subr.bf16.mxu0 %v571_v21 }
  0x28   :  { %530 = vmatprep.subr.bf16.mxu1 %v572_v22 }
  0x2a   :  { %509 = vmatpush3.bf16.msra.mxu0 %v573_v23 }
  0x2b   :  { %531 = vmatpush3.bf16.msra.mxu1 %v574_v24  ;;  %510 = vmatprep.subr.bf16.mxu0 %v575_v25 }
  0x2c   :  { %532 = vmatprep.subr.bf16.mxu1 %v576_v26 }
  0x2e   :  { %511 = vmatpush3.bf16.msra.mxu0 %v577_v27 }
  0x2f   :  { %533 = vmatpush3.bf16.msra.mxu1 %v578_v28  ;;  %512 = vmatprep.subr.bf16.mxu0 %v579_v29 }
  0x30   :  { %534 = vmatprep.subr.bf16.mxu1 %v580_v30 }
  0x32   :  { %513 = vmatpush3.bf16.msra.mxu0 %v581_v31 }
  0x33   :  { %535 = vmatpush3.bf16.msra.mxu1 %v582_v32 }
  0x35   :  { %349 = vmatmul.mubr.bf16.vlgmr.msra.gmra.mrb[0].mxu0 %v583_v33 }
  0x36   :  { %390 = vmatmul.mubr.bf16.vlgmr.msra.gmra.mrb[0].mxu1 %v586_v35 }
  0x9c   :  { %v403_v41 = vpop.permute.xlu0 %402 }
  0x9d   :  { %v430_v56 = vpop.permute.xlu1 %429 }
  0x9e   :  { %vm434_vm0 = vcmp.eq.s32.totalorder %v423_v61, %v430_v56 }
  0xa0   :  { %v408_v60 = vpop.permute.xlu0 %407 }
  0xa1   :  { %v433_v2 = vpop.permute.xlu1 %432 }
  0xa2   :  { %vm435_vm1 = vcmp.eq.s32.totalorder %v423_v61, %v433_v2 }
 0x108   :  { %v514_v42 = vpop.f32.mrb[0].mxu0 }
 0x109   :  { %v536_v43 = vpop.f32.mrb[0].mxu1  ;;  %v515_v44 = vpop.f32.mrb[1].mxu0 }
 0x10a   :  { %v516_v45 = vadd.f32 %v515_v44, %v514_v42  ;;  %v537_v46 = vpop.f32.mrb[1].mxu1  ;;  %v517_v47 = vpop.f32.mrb[2].mxu0 }
 0x10b   :  { %v538_v48 = vadd.f32 %v537_v46, %v536_v43  ;;  %v539_v49 = vpop.f32.mrb[2].mxu1  ;;  %v518_v50 = vpop.f32.mrb[3].mxu0 }
 0x10c   :  { %v519_v51 = vadd.f32 %v518_v50, %v517_v47  ;;  %v540_v52 = vpop.f32.mrb[3].mxu1 }
 0x10d   :  { %v392_v54 = vadd.f32 %v538_v48, %v516_v45  ;;  %v541_v55 = vadd.f32 %v540_v52, %v539_v49 }
 0x10f   :  { %v410_v58 = vmul.f32 %v403_v41, %v392_v54  ;;  %v395_v59 = vadd.f32 %v541_v55, %v519_v51 }
 0x111   :  { %v419_v62 = vmul.f32 %v495_v57, %v410_v58  ;;  %v411_v63 = vmul.f32 %v408_v60, %v395_v59 }
 0x113   :  { %v420_v0 = vmul.f32 %v495_v57, %v411_v63  ;;  %v496_v1 = vadd.f32 -10.5, %v419_v62 }
 0x115   :  { %v438_v3 = vsel %vm434_vm0, %v496_v1, %v419_v62  ;;  %v497_v4 = vadd.f32 -10.5, %v420_v0 }
 0x116   :  { %440 = vst [vmem:[#allocation5] sm:$0xff] %v438_v3 }
 0x117   :  { %v439_v5 = vsel %vm435_vm1, %v497_v4, %v420_v0 }
 0x118   :  { %441 = vst [vmem:[#allocation5 + $0x8] sm:$0xff] %v439_v5 }
 0x119   :  { %622 = shalt.err (!%p619_p12)
}
 0x11a   :  { %s623_s25 = scalar_lea.hbm %s730_s5, 256 }
 0x11b   :  { %p624_p13 = scmp.ne.s32.totalorder %s730_s5, %s623_s25  ;;  %p627_p0 = scmp.lt.u32.totalorder %s623_s25, %s730_s5 }
 0x11d   :  { %p629_p1 = pnand %p627_p0, %p624_p13 }
 0x11f   :  { %632 = shalt.err (!%p629_p1)
}
 0x120   :  { %s642_s30 = smov 128   ;;  %s643_s6 = smov 8  }
 0x121   :  { %453 = dma.vmem_to_hbm [thread:$0]  %s448_s22, 256, %s730_s5, [#allocation4], %s642_s30, %s642_s30, %s643_s6  }
 0x122   :  { %635 = dma.done.wait [#allocation4], 256  }
 0x123   :  { %636 = vsyncadd [#allocation4], 4294967040 }
 0x124   :  { %457 = vsyncpa [#allocation3], 1 }
 0x125   :  { %458 = vsyncpa [#allocation4], 1 }

</bundles_post_ra>
